<compile_context>
chip_gen: v5e
topology: v5e:2x2
jax: 0.10.0
libtpu: 0.0.40
codegen_flags: <defaults>
</compile_context>

<pallas_src>
import jax
import jax.numpy as jnp
from jax import lax
from jax.experimental import pallas as pl
from jax.experimental.pallas import tpu as pltpu

HIDDEN = 64       # logical hidden width of the PyTorch module
HIDDEN_PAD = 128  # padded to a full lane width (extra MXU columns are free)


def reward_mlp_kernel(s_ref, a_ref, w1s_ref, w1a_ref, b1_ref,
                      w2_ref, b2_ref, w3_ref, b3_ref, o_ref):
    cd = w1s_ref.dtype   # MXU compute dtype; accumulation / bias / ReLU are f32

    # fc1: concat(state, action) @ W1  ==  state @ W1_s + action @ W1_a
    h1 = jnp.dot(s_ref[...].astype(cd), w1s_ref[...],
                 preferred_element_type=jnp.float32)
    h1 = h1 + jnp.dot(a_ref[...].astype(cd), w1a_ref[...],
                      preferred_element_type=jnp.float32)
    h1 = jnp.maximum(h1 + b1_ref[...], 0.0)                       # (TB, 128) f32

    # fc2
    h2 = jnp.dot(h1.astype(cd), w2_ref[...],
                 preferred_element_type=jnp.float32)
    h2 = jnp.maximum(h2 + b2_ref[...], 0.0)                       # (TB, 128) f32

    # fc3 as a trans-B matmul so the stored result (1, TB) is lane-dense.
    out_t = lax.dot_general(
        w3_ref[...], h2.astype(cd),
        dimension_numbers=(((1,), (1,)), ((), ())),
        preferred_element_type=jnp.float32)                       # (1, TB)
    o_ref[...] = (out_t + b3_ref[...]).astype(o_ref.dtype)


def _round_up(x, m):
    return ((x + m - 1) // m) * m


def reward_model_forward(state, action, params, *, block_b=2048,
                         compute_dtype=jnp.bfloat16):
    """state: (B, state_size), action: (B, action_size) -> (B, 1) float32."""
    w1, b1, w2, b2, w3, b3 = params
    B, state_size = state.shape
    action_size = action.shape[1]

    # ---- weight prep: split fc1 (fuses the concat) and pad hidden 64 -> 128.
    hp = HIDDEN_PAD - HIDDEN
    cd = compute_dtype
    w1s = jnp.pad(w1[:state_size], ((0, 0), (0, hp))).astype(cd)   # (S, 128)
    w1a = jnp.pad(w1[state_size:], ((0, 0), (0, hp))).astype(cd)   # (A, 128)
    b1p = jnp.pad(b1.reshape(1, -1), ((0, 0), (0, hp)))            # (1, 128) f32
    w2p = jnp.pad(w2, ((0, hp), (0, hp))).astype(cd)               # (128, 128)
    b2p = jnp.pad(b2.reshape(1, -1), ((0, 0), (0, hp)))            # (1, 128) f32
    w3r = jnp.pad(w3.T, ((0, 0), (0, hp))).astype(cd)              # (1, 128)
    b3p = b3.reshape(1, 1)                                         # (1, 1)  f32

    # ---- batch tiling (no wrapper-side batch pad; Pallas masks the partial
    #      last block).  Tile is a multiple of 128 so the (1, tb) output store
    #      stays unmasked; keep >=2 blocks when B allows so v7x can shard the
    #      batch axis across both TensorCores; cap (default 2048 rows) keeps
    #      the double-buffered working set inside v5e's 16 MiB scoped VMEM.
    if B <= 128:
        tb = B
    else:
        tb = min(block_b, pl.cdiv(B, 2))
        tb = max(128, _round_up(tb, 128))
    num_blocks = pl.cdiv(B, tb)

    row_spec = lambda feat: pl.BlockSpec((tb, feat), lambda i: (i, 0))
    resident = lambda arr: pl.BlockSpec(arr.shape, lambda i: (0, 0))

    out_t = pl.pallas_call(
        reward_mlp_kernel,
        out_shape=jax.ShapeDtypeStruct((1, B), jnp.float32),
        grid=(num_blocks,),
        in_specs=[
            row_spec(state_size),          # state tile  (TB, S)  streamed
            row_spec(action_size),         # action tile (TB, A)  streamed
            resident(w1s), resident(w1a), resident(b1p),
            resident(w2p), resident(b2p),
            resident(w3r), resident(b3p),
        ],
        out_specs=pl.BlockSpec((1, tb), lambda i: (0, i)),   # lane-dense store
        compiler_params=pltpu.CompilerParams(
            dimension_semantics=("parallel",)),
    )(state, action, w1s, w1a, b1p, w2p, b2p, w3r, b3p)

    return out_t.reshape(B, 1)


def init_params(key, state_size, action_size, hidden=HIDDEN):
    """Deterministic init mimicking torch.nn.Linear default (uniform +-1/sqrt(fan_in))."""
    dims = [(state_size + action_size, hidden), (hidden, hidden), (hidden, 1)]
    params = []
    for (fan_in, fan_out) in dims:
        key, kw, kb = jax.random.split(key, 3)
        bound = 1.0 / jnp.sqrt(fan_in)
        w = jax.random.uniform(kw, (fan_in, fan_out), jnp.float32, -bound, bound)
        b = jax.random.uniform(kb, (1, fan_out), jnp.float32, -bound, bound)
        params += [w, b]
    return tuple(params)


def reward_model_ref(state, action, params):
    w1, b1, w2, b2, w3, b3 = params
    x = jnp.concatenate([state, action], axis=-1)
    h1 = jnp.maximum(x @ w1 + b1, 0.0)
    h2 = jnp.maximum(h1 @ w2 + b2, 0.0)
    return h2 @ w3 + b3


if __name__ == "__main__":
    fwd = jax.jit(reward_model_forward, static_argnames=("block_b", "compute_dtype"))

    key = jax.random.PRNGKey(0)
    batch, state_size, action_size = 8, 24, 8
    k_params, k_s1, k_a1, k_s2, k_a2 = jax.random.split(key, 5)
    params = init_params(k_params, state_size, action_size)

    # Small batch, f32 compute: single grid block, tight tolerance.
    state = jax.random.normal(k_s1, (batch, state_size), jnp.float32)
    action = jax.random.normal(k_a1, (batch, action_size), jnp.float32)
    out = jax.block_until_ready(fwd(state, action, params,
                                    compute_dtype=jnp.float32))
    ref = reward_model_ref(state, action, params)
    assert out.shape == (batch, 1), out.shape
    assert jnp.allclose(out, ref, atol=1e-4, rtol=1e-4), "f32 mismatch (small batch)"

    # Larger batch not a multiple of the tile: 2-block grid (both TCs on v7x),
    # partial last block handled by Pallas (no wrapper-side batch pad).
    B2 = 200
    state2 = jax.random.normal(k_s2, (B2, state_size), jnp.float32)
    action2 = jax.random.normal(k_a2, (B2, action_size), jnp.float32)
    out2 = jax.block_until_ready(fwd(state2, action2, params,
                                     compute_dtype=jnp.float32))
    ref2 = reward_model_ref(state2, action2, params)
    assert out2.shape == (B2, 1), out2.shape
    assert jnp.allclose(out2, ref2, atol=1e-4, rtol=1e-4), "f32 mismatch (tiled batch)"

    # Default path: bf16 MXU inputs (cast in-kernel) with f32 accumulation.
    out_bf16 = jax.block_until_ready(fwd(state2, action2, params))
    assert out_bf16.shape == (B2, 1), out_bf16.shape
    assert jnp.allclose(out_bf16, ref2, atol=5e-2, rtol=5e-2), "bf16 mismatch"

    print("KERNEL_OK")
</pallas_src>

<mosaic_0001>
module attributes {stable_mosaic.version = 11 : i64} {
  func.func @reward_mlp_kernel(%arg0: i32, %arg1: memref<8x24xf32, #tpu.memory_space<vmem>>, %arg2: memref<8x8xf32, #tpu.memory_space<vmem>>, %arg3: memref<24x128xf32, #tpu.memory_space<vmem>>, %arg4: memref<8x128xf32, #tpu.memory_space<vmem>>, %arg5: memref<1x128xf32, #tpu.memory_space<vmem>>, %arg6: memref<128x128xf32, #tpu.memory_space<vmem>>, %arg7: memref<1x128xf32, #tpu.memory_space<vmem>>, %arg8: memref<1x128xf32, #tpu.memory_space<vmem>>, %arg9: memref<1x1xf32, #tpu.memory_space<vmem>>, %arg10: memref<1x8xf32, #tpu.memory_space<vmem>>) attributes {dimension_semantics = [#tpu.dimension_semantics<parallel>], iteration_bounds = array<i64: 1>, scalar_prefetch = 0 : i64, scratch_operands = 0 : i64, tpu.core_type = #tpu.core_type<tc>, window_params = [{transform_indices = @transform_0, window_bounds = array<i64: 8, 24>}, {transform_indices = @transform_1, window_bounds = array<i64: 8, 8>}, {pipeline_mode = #tpu.pipeline_mode<synchronous>, transform_indices = @transform_2, window_bounds = array<i64: 24, 128>}, {pipeline_mode = #tpu.pipeline_mode<synchronous>, transform_indices = @transform_3, window_bounds = array<i64: 8, 128>}, {pipeline_mode = #tpu.pipeline_mode<synchronous>, transform_indices = @transform_4, window_bounds = array<i64: 1, 128>}, {pipeline_mode = #tpu.pipeline_mode<synchronous>, transform_indices = @transform_5, window_bounds = array<i64: 128, 128>}, {pipeline_mode = #tpu.pipeline_mode<synchronous>, transform_indices = @transform_6, window_bounds = array<i64: 1, 128>}, {pipeline_mode = #tpu.pipeline_mode<synchronous>, transform_indices = @transform_7, window_bounds = array<i64: 1, 128>}, {pipeline_mode = #tpu.pipeline_mode<synchronous>, transform_indices = @transform_8, window_bounds = array<i64: 1, 1>}, {transform_indices = @transform_9, window_bounds = array<i64: 1, 8>}]} {
    %c0 = arith.constant 0 : index
    %c0_0 = arith.constant 0 : index
    %0 = vector.load %arg1[%c0, %c0_0] : memref<8x24xf32, #tpu.memory_space<vmem>>, vector<8x24xf32>
    %c0_1 = arith.constant 0 : index
    %c0_2 = arith.constant 0 : index
    %1 = vector.load %arg3[%c0_1, %c0_2] : memref<24x128xf32, #tpu.memory_space<vmem>>, vector<24x128xf32>
    %cst = arith.constant dense<0.000000e+00> : vector<8x128xf32>
    %2 = tpu.matmul %0, %1, %cst {dimension_numbers = #tpu.dot_dimension_numbers<[1], [0], [0], [1], [0, 0, 1, 1], [], []>} : vector<8x24xf32>, vector<24x128xf32>, vector<8x128xf32> -> vector<8x128xf32>
    %c0_3 = arith.constant 0 : index
    %c0_4 = arith.constant 0 : index
    %3 = vector.load %arg2[%c0_3, %c0_4] : memref<8x8xf32, #tpu.memory_space<vmem>>, vector<8x8xf32>
    %c0_5 = arith.constant 0 : index
    %c0_6 = arith.constant 0 : index
    %4 = vector.load %arg4[%c0_5, %c0_6] : memref<8x128xf32, #tpu.memory_space<vmem>>, vector<8x128xf32>
    %cst_7 = arith.constant dense<0.000000e+00> : vector<8x128xf32>
    %5 = tpu.matmul %3, %4, %cst_7 {dimension_numbers = #tpu.dot_dimension_numbers<[1], [0], [0], [1], [0, 0, 1, 1], [], []>} : vector<8x8xf32>, vector<8x128xf32>, vector<8x128xf32> -> vector<8x128xf32>
    %6 = arith.addf %2, %5 : vector<8x128xf32>
    %c0_8 = arith.constant 0 : index
    %c0_9 = arith.constant 0 : index
    %7 = vector.load %arg5[%c0_8, %c0_9] : memref<1x128xf32, #tpu.memory_space<vmem>>, vector<1x128xf32>
    %8 = vector.broadcast %7 : vector<1x128xf32> to vector<8x128xf32>
    %9 = arith.addf %6, %8 : vector<8x128xf32>
    %cst_10 = arith.constant 0.000000e+00 : f32
    %10 = vector.broadcast %cst_10 : f32 to vector<8x128xf32>
    %11 = arith.maximumf %9, %10 : vector<8x128xf32>
    %c0_11 = arith.constant 0 : index
    %c0_12 = arith.constant 0 : index
    %12 = vector.load %arg6[%c0_11, %c0_12] : memref<128x128xf32, #tpu.memory_space<vmem>>, vector<128x128xf32>
    %cst_13 = arith.constant dense<0.000000e+00> : vector<8x128xf32>
    %13 = tpu.matmul %11, %12, %cst_13 {dimension_numbers = #tpu.dot_dimension_numbers<[1], [0], [0], [1], [0, 0, 1, 1], [], []>} : vector<8x128xf32>, vector<128x128xf32>, vector<8x128xf32> -> vector<8x128xf32>
    %c0_14 = arith.constant 0 : index
    %c0_15 = arith.constant 0 : index
    %14 = vector.load %arg7[%c0_14, %c0_15] : memref<1x128xf32, #tpu.memory_space<vmem>>, vector<1x128xf32>
    %15 = vector.broadcast %14 : vector<1x128xf32> to vector<8x128xf32>
    %16 = arith.addf %13, %15 : vector<8x128xf32>
    %cst_16 = arith.constant 0.000000e+00 : f32
    %17 = vector.broadcast %cst_16 : f32 to vector<8x128xf32>
    %18 = arith.maximumf %16, %17 : vector<8x128xf32>
    %c0_17 = arith.constant 0 : index
    %c0_18 = arith.constant 0 : index
    %19 = vector.load %arg8[%c0_17, %c0_18] : memref<1x128xf32, #tpu.memory_space<vmem>>, vector<1x128xf32>
    %cst_19 = arith.constant dense<0.000000e+00> : vector<1x8xf32>
    %20 = tpu.matmul %19, %18, %cst_19 {dimension_numbers = #tpu.dot_dimension_numbers<[1], [1], [0], [0], [0, 0, 1, 0], [], []>} : vector<1x128xf32>, vector<8x128xf32>, vector<1x8xf32> -> vector<1x8xf32>
    %c0_20 = arith.constant 0 : index
    %c0_21 = arith.constant 0 : index
    %21 = vector.load %arg9[%c0_20, %c0_21] : memref<1x1xf32, #tpu.memory_space<vmem>>, vector<1x1xf32>
    %22 = vector.broadcast %21 : vector<1x1xf32> to vector<1x8xf32>
    %23 = arith.addf %20, %22 : vector<1x8xf32>
    %c0_22 = arith.constant 0 : index
    %c0_23 = arith.constant 0 : index
    %24 = vector.load %arg10[%c0_22, %c0_23] : memref<1x8xf32, #tpu.memory_space<vmem>>, vector<1x8xf32>
    tpu.vector_store %arg10[%c0_22, %c0_23], %23 {strides = array<i32>} : memref<1x8xf32, #tpu.memory_space<vmem>>, vector<1x8xf32>,
    return
  }
  func.func @transform_0(%arg0: i32) -> (i32, i32) {
    %c0_i32 = arith.constant 0 : i32
    %c0_i32_0 = arith.constant 0 : i32
    return %arg0, %c0_i32 : i32, i32
  }
  func.func @transform_1(%arg0: i32) -> (i32, i32) {
    %c0_i32 = arith.constant 0 : i32
    %c0_i32_0 = arith.constant 0 : i32
    return %arg0, %c0_i32 : i32, i32
  }
  func.func @transform_2(%arg0: i32) -> (i32, i32) {
    %c0_i32 = arith.constant 0 : i32
    %c0_i32_0 = arith.constant 0 : i32
    %c0_i32_1 = arith.constant 0 : i32
    return %c0_i32, %c0_i32_0 : i32, i32
  }
  func.func @transform_3(%arg0: i32) -> (i32, i32) {
    %c0_i32 = arith.constant 0 : i32
    %c0_i32_0 = arith.constant 0 : i32
    %c0_i32_1 = arith.constant 0 : i32
    return %c0_i32, %c0_i32_0 : i32, i32
  }
  func.func @transform_4(%arg0: i32) -> (i32, i32) {
    %c0_i32 = arith.constant 0 : i32
    %c0_i32_0 = arith.constant 0 : i32
    %c0_i32_1 = arith.constant 0 : i32
    return %c0_i32, %c0_i32_0 : i32, i32
  }
  func.func @transform_5(%arg0: i32) -> (i32, i32) {
    %c0_i32 = arith.constant 0 : i32
    %c0_i32_0 = arith.constant 0 : i32
    %c0_i32_1 = arith.constant 0 : i32
    return %c0_i32, %c0_i32_0 : i32, i32
  }
  func.func @transform_6(%arg0: i32) -> (i32, i32) {
    %c0_i32 = arith.constant 0 : i32
    %c0_i32_0 = arith.constant 0 : i32
    %c0_i32_1 = arith.constant 0 : i32
    return %c0_i32, %c0_i32_0 : i32, i32
  }
  func.func @transform_7(%arg0: i32) -> (i32, i32) {
    %c0_i32 = arith.constant 0 : i32
    %c0_i32_0 = arith.constant 0 : i32
    %c0_i32_1 = arith.constant 0 : i32
    return %c0_i32, %c0_i32_0 : i32, i32
  }
  func.func @transform_8(%arg0: i32) -> (i32, i32) {
    %c0_i32 = arith.constant 0 : i32
    %c0_i32_0 = arith.constant 0 : i32
    %c0_i32_1 = arith.constant 0 : i32
    return %c0_i32, %c0_i32_0 : i32, i32
  }
  func.func @transform_9(%arg0: i32) -> (i32, i32) {
    %c0_i32 = arith.constant 0 : i32
    %c0_i32_0 = arith.constant 0 : i32
    return %c0_i32, %arg0 : i32, i32
  }
}

</mosaic_0001>

<bundles_post_ra>
// kernel: reward_model_forward.1
= control target key start
LH: loop header
LB: loop body
LE: loop exit
PB: predicated region body
PF: predicated region fallthrough
CT: control target
= control target key end

     0   :  { %s348_s0 = inlined_call_operand.vmem [shape: f32[8,24], index: 0, kind: input, shape index: {}]   ;;  %s349_s1 = inlined_call_operand.vmem [shape: f32[8,8], index: 1, kind: input, shape index: {}]   ;;  %s350_s2 = inlined_call_operand.vmem [shape: f32[24,128], index: 2, kind: input, shape index: {}]   ;;  %s351_s3 = inlined_call_operand.vmem [shape: f32[8,128], index: 3, kind: input, shape index: {}]   ;;  %s352_s4 = inlined_call_operand.vmem [shape: f32[1,128], index: 4, kind: input, shape index: {}]   ;;  %s353_s5 = inlined_call_operand.vmem [shape: f32[128,128], index: 5, kind: input, shape index: {}]   ;;  %s354_s6 = inlined_call_operand.vmem [shape: f32[1,128], index: 6, kind: input, shape index: {}]   ;;  %s355_s7 = inlined_call_operand.vmem [shape: f32[1,128], index: 7, kind: input, shape index: {}]   ;;  %s356_s8 = inlined_call_operand.<no memory space> [shape: f32[1,1], index: 8, kind: input, shape index: {}]   ;;  %s357_s9 = inlined_call_operand.hbm [shape: f32[1,8], index: 9, kind: output, shape index: {}]  }
   0x1   :  { %v14_v0 = vstv %s356_s8 }
   0x2   :  { %15 = vst [vmem:[#allocation2] sm:$0x1] %v14_v0 }
   0x3   :  { %v38_v1 = vld [vmem:[%s350_s2 + $0x10] sm:$0xff]  ;;  %v37_v2 = vld [vmem:[%s350_s2 + $0x8] sm:$0xff]  ;;  %v40_v3 = vld [vmem:[%s351_s3] sm:$0xff]  ;;  %vm41_vm0 = vcmask 64512   ;;  %vm65_vm1 = vcmask 195584  }
   0x4   :  { %82 = vmatpush.msra.mxu1 %v38_v1  ;;  %60 = vmatpush.msra.mxu0 %v40_v3  ;;  %v39_v4 = vld [vmem:[%s349_s1] sm:$0xff]  ;;  %v110_v6 = vld [vmem:[%s353_s5 + $0x78] sm:$0xff]  ;;  %v109_v7 = vld [vmem:[%s353_s5 + $0x70] sm:$0xff] }
   0x5   :  { %v36_v5 = vld [vmem:[%s350_s2] sm:$0xff]  ;;  %182 = vmatmul.msk.f32.vlgmr.msra.gmra.mxu0 %vm41_vm0, %v39_v4  ;;  %115 = vmatpush.msra.mxu2 %v110_v6  ;;  %v108_v9 = vld [vmem:[%s353_s5 + $0x68] sm:$0xff] }
   0x6   :  { %83 = vmatpush.msra.mxu1 %v37_v2  ;;  %v35_v8 = vld [vmem:[%s348_s0] sm:$0xff] }
   0x7   :  { %116 = vmatpush.msra.mxu2 %v109_v7  ;;  %v107_v10 = vld [vmem:[%s353_s5 + $0x60] sm:$0xff] }
   0x8   :  { %84 = vmatpush.msra.mxu1 %v36_v5 }
   0x9   :  { %183 = vmatmul.msk.f32.vlgmr.msra.gmra.mxu1 %vm65_vm1, %v35_v8 }
   0xa   :  { %16 = vsyncpa [#allocation4], 0  ;;  %117 = vmatpush.msra.mxu2 %v108_v9  ;;  %v106_v11 = vld [vmem:[%s353_s5 + $0x58] sm:$0xff]  ;;  %v105_v12 = vld [vmem:[%s353_s5 + $0x50] sm:$0xff]  ;;  %v215_v30 = vmov 0   ;;  %s173_s11 = sshll.u32 %s357_s9, 4  ;;  %s174_s11 = int_to_ptr.hbm [resolvable:$true] %s173_s11 }
   0xb   :  { %v104_v13 = vld [vmem:[%s353_s5 + $0x48] sm:$0xff]  ;;  %v103_v14 = vld [vmem:[%s353_s5 + $0x40] sm:$0xff]  ;;  %v102_v15 = vld [vmem:[%s353_s5 + $0x38] sm:$0xff]  ;;  %186 = vset.pattern.permute.xlu0 %v215_v30  ;;  %vm164_vm2 = vcmask 57344  }
   0xc   :  { %118 = vmatpush.msra.mxu2 %v107_v10  ;;  %v101_v16 = vld [vmem:[%s353_s5 + $0x30] sm:$0xff]  ;;  %v100_v17 = vld [vmem:[%s353_s5 + $0x28] sm:$0xff]  ;;  %v99_v18 = vld [vmem:[%s353_s5 + $0x20] sm:$0xff] }
   0xd   :  { %v98_v19 = vld [vmem:[%s353_s5 + $0x18] sm:$0xff]  ;;  %v97_v20 = vld [vmem:[%s353_s5 + $0x10] sm:$0xff]  ;;  %v96_v21 = vld [vmem:[%s353_s5 + $0x8] sm:$0xff] }
   0xe   :  { %119 = vmatpush.msra.mxu2 %v106_v11  ;;  %v95_v22 = vld [vmem:[%s353_s5] sm:$0xff] }
   0xf   :  { %v187_v24 = vld [vmem:[%s352_s4] ss:$0 sm:$0xff]  ;;  %s216_s4 = smov [#allocation3]  }
  0x10   :  { %120 = vmatpush.msra.mxu2 %v105_v12  ;;  %v137_v29 = vld [vmem:[#allocation2] sm:$0x1]  ;;  %s171_s29 = sshll.u32 %s216_s4, 4  ;;  %s172_s29 = int_to_ptr.vmem [resolvable:$true] %s171_s29 }
  0x11   :  { %140 = vperm.xlu0 %186, %v137_v29   ;;  %v188_v31 = vld [vmem:[%s354_s6] ss:$0 sm:$0xff] }
  0x12   :  { %121 = vmatpush.msra.mxu2 %v104_v13  ;;  %v136_v35 = vld [vmem:[%s355_s7] sm:$0x1] }
  0x14   :  { %122 = vmatpush.msra.mxu2 %v103_v14 }
  0x16   :  { %123 = vmatpush.msra.mxu2 %v102_v15 }
  0x18   :  { %124 = vmatpush.msra.mxu2 %v101_v16 }
  0x1a   :  { %125 = vmatpush.msra.mxu2 %v100_v17 }
  0x1c   :  { %126 = vmatpush.msra.mxu2 %v99_v18 }
  0x1e   :  { %127 = vmatpush.msra.mxu2 %v98_v19 }
  0x20   :  { %128 = vmatpush.msra.mxu2 %v97_v20 }
  0x22   :  { %129 = vmatpush.msra.mxu2 %v96_v21 }
  0x24   :  { %130 = vmatpush.msra.mxu2 %v95_v22 }
  0x82   :  { %v62_v23 = vpop.f32.mrf.mxu0 }
  0x83   :  { %v141_v36 = vpop.permute.xlu0 %140 }
  0x84   :  { %v143_v37 = vperm.slane %v141_v36, 0 }
  0x86   :  { %v86_v25 = vpop.f32.mrf.mxu1 }
  0x87   :  { %v87_v26 = vadd.f32 %v86_v25, %v62_v23 }
  0x89   :  { %v93_v27 = vadd.f32 %v187_v24, %v87_v26 }
  0x8b   :  { %v94_v28 = vmax.f32 %v93_v27, 0.0 }
  0x8d   :  { %131 = vmatmul.f32.vlgmr.msra.gmra.mxu2 %v94_v28 }
 0x110   :  { %v132_v32 = vpop.f32.mrf.mxu2 }
 0x111   :  { %v133_v33 = vadd.f32 %v188_v31, %v132_v32 }
 0x113   :  { %v135_v34 = vmax.f32 %v133_v33, 0.0 }
 0x115   :  { %159 = vmatpush.xpose.msra.mxu3 %v135_v34 }
 0x118   :  { %160 = vmatmul.f32.vlgmr.msra.gmra.mxu3 %v136_v35 }
 0x19b   :  { %v161_v38 = vpop.f32.mrf.mxu3 }
 0x19c   :  { %v162_v39 = vadd.f32 %v161_v38, %v143_v37 }
 0x19e   :  { %165 = vst.msk [vmem:[#allocation3] sm:$0x1] %vm164_vm2, %v162_v39 }
 0x19f   :  { %176 = dma.vmem_to_hbm [thread:$0]  %s172_s29, 16, %s174_s11, [#allocation4]  }
 0x1a0   :  { %213 = dma.done.wait [#allocation4], 16  }
 0x1a1   :  { %214 = vsyncadd [#allocation4], 4294967280 }
 0x1a2   :  { %181 = vsyncpa [#allocation4], 1 }

</bundles_post_ra>
